<compile_context>
chip_gen: v7x
topology: tpu7x:2x2x1
jax: 0.10.0
libtpu: 0.0.40
codegen_flags: <defaults>
</compile_context>

<pallas_src>
import functools

import jax
import jax.numpy as jnp
from jax import lax
from jax.experimental import pallas as pl
from jax.experimental.pallas import tpu as pltpu


# ----------------------------- Pallas kernel -------------------------------

def _fused_forward_kernel(*refs, n_layers, relu_flags):
    """h = maybe_relu((h @ W_i) * scale_i + shift_i) chained for n_layers stages.

    refs layout: [x, W_0..W_{n-1}, scale_0..scale_{n-1}, shift_0..shift_{n-1}, out].
    W_i are bf16 (MXU inputs); accumulation and the epilogue are f32.
    Activations stay in VMEM/vregs for the whole stack.
    """
    x_ref = refs[0]
    w_refs = refs[1:1 + n_layers]
    s_refs = refs[1 + n_layers:1 + 2 * n_layers]
    b_refs = refs[1 + 2 * n_layers:1 + 3 * n_layers]
    o_ref = refs[1 + 3 * n_layers]

    h = x_ref[...].astype(jnp.float32)
    for i in range(n_layers):
        y = jnp.dot(h.astype(jnp.bfloat16), w_refs[i][...],
                    preferred_element_type=jnp.float32)
        y = y * s_refs[i][...] + b_refs[i][...]
        h = jnp.maximum(y, 0.0) if relu_flags[i] else y
    o_ref[...] = h.astype(o_ref.dtype)


def fused_forward(x, layers, *, block_rows=128):
    """Run the whole unfolded network in one pallas_call.

    x: (B, K0) f32.  layers: list of (W (K,N) f32, scale (N,), shift (N,), relu).
    """
    B, k0 = x.shape
    n_layers = len(layers)
    ws = [w.astype(jnp.bfloat16) for (w, _, _, _) in layers]
    ss = [s.reshape(1, -1).astype(jnp.float32) for (_, s, _, _) in layers]
    bs = [b.reshape(1, -1).astype(jnp.float32) for (_, _, b, _) in layers]
    relu_flags = tuple(bool(r) for (_, _, _, r) in layers)
    n_out = ws[-1].shape[1]

    tb = B if B <= block_rows else block_rows          # batch-row tile
    grid = (pl.cdiv(B, tb),)

    in_specs = [pl.BlockSpec((tb, k0), lambda i: (i, 0))]
    in_specs += [pl.BlockSpec(w.shape, lambda i: (0, 0)) for w in ws]
    in_specs += [pl.BlockSpec(s.shape, lambda i: (0, 0)) for s in ss]
    in_specs += [pl.BlockSpec(b.shape, lambda i: (0, 0)) for b in bs]

    return pl.pallas_call(
        functools.partial(_fused_forward_kernel, n_layers=n_layers,
                          relu_flags=relu_flags),
        out_shape=jax.ShapeDtypeStruct((B, n_out), jnp.float32),
        grid=grid,
        in_specs=in_specs,
        out_specs=pl.BlockSpec((tb, n_out), lambda i: (i, 0)),
        compiler_params=pltpu.CompilerParams(
            dimension_semantics=("parallel",)),   # rows shard across v7x's 2 TCs
    )(x.astype(jnp.float32), *ws, *ss, *bs)


# --------------------- host-side weight-only preparation --------------------

def fold_bn(bias, gamma, beta, running_mean, running_var, eps=1e-5):
    """Fold layer bias + eval-mode BatchNorm into per-feature scale/shift."""
    scale = gamma / jnp.sqrt(running_var + eps)
    shift = beta + scale * (bias - running_mean)
    return scale, shift


def conv1d_as_dense(w, l_in, stride, pad):
    """Unfold a Conv1d weight (C_out, C_in, k) into a dense (L_in*C_in, L_out*C_out)
    matrix acting on channels-last flattened activations (index = l*C + c).
    The convolution's zero padding is folded in (out-of-range taps drop out)."""
    c_out, c_in, k = w.shape
    l_out = (l_in + 2 * pad - k) // stride + 1
    m = jnp.zeros((l_in * c_in, l_out * c_out), jnp.float32)
    for lo in range(l_out):
        for kk in range(k):
            li = lo * stride + kk - pad
            if 0 <= li < l_in:
                m = m.at[li * c_in:(li + 1) * c_in,
                         lo * c_out:(lo + 1) * c_out].set(w[:, :, kk].T)
    return m, l_out


def build_gemm_stack(params, config):
    """Lower the whole module to a chain of (W, scale, shift, relu) GEMM stages."""
    layers = []
    l, c = config['seq_len'], 1
    for i, p in enumerate(params['convs']):
        stride = config['conv_stride'][i]
        kern = config['kernel_size'][i]
        w_mat, l_out = conv1d_as_dense(p['w'], l, stride, kern // 2)
        scale, shift = fold_bn(p['b'], p['gamma'], p['beta'], p['mean'], p['var'])
        c_out = p['w'].shape[0]
        # channels-last flatten -> epilogue vectors repeat the per-channel BN per position
        layers.append((w_mat, jnp.tile(scale, l_out), jnp.tile(shift, l_out), True))
        l, c = l_out, c_out

    # PyTorch flattens the (B, C, L) conv output channel-major (index c*L + l); the
    # kernel keeps channels-last (index l*C + c), so permute the columns of the first
    # post-flatten weight instead of transposing the activation.
    def first_weight(w):      # (out, C*L) torch order -> (L*C, out)
        out = w.shape[0]
        if w.shape[1] != c * l:
            raise ValueError(
                f"dense in_size {w.shape[1]} != conv output size {c * l}; the "
                "module's `seq_len // stride + 1` bookkeeping only matches the true "
                "conv output length for some (kernel_size, stride) configs.")
        return w.reshape(out, c, l).transpose(0, 2, 1).reshape(out, l * c).T

    is_first = True
    for p in params['dense']:
        w_mat = first_weight(p['w']) if is_first else p['w'].T
        is_first = False
        scale, shift = fold_bn(p['b'], p['gamma'], p['beta'], p['mean'], p['var'])
        layers.append((w_mat, scale, shift, True))     # Dropout == identity in eval

    p = params['out']
    w_mat = first_weight(p['w']) if is_first else p['w'].T
    layers.append((w_mat, jnp.ones((p['w'].shape[0],), jnp.float32), p['b'], False))
    return layers


def conv_transformer_forward(params, config, x, labels=None):
    """x: (B, seq_len) f32 -> (B, 1) (and mean L1 loss if labels are given)."""
    layers = build_gemm_stack(params, config)
    out = fused_forward(x, layers)
    if labels is not None:
        return out, jnp.mean(jnp.abs(out - labels))    # nn.L1Loss (mean reduction)
    return out


# ------------------------------- params -------------------------------------

def init_params(config, key):
    filters = [1] + config['n_filters']
    params = {'convs': [], 'dense': []}
    for i, k in enumerate(config['kernel_size']):
        key, k1, k2, k3, k4 = jax.random.split(key, 5)
        c_in, c_out = filters[i], filters[i + 1]
        params['convs'].append(dict(
            w=0.2 * jax.random.normal(k1, (c_out, c_in, k), jnp.float32),
            b=0.1 * jax.random.normal(k2, (c_out,), jnp.float32),
            gamma=1.0 + 0.1 * jax.random.normal(k3, (c_out,), jnp.float32),
            beta=0.1 * jax.random.normal(k4, (c_out,), jnp.float32),
            mean=jnp.zeros((c_out,), jnp.float32),
            var=jnp.ones((c_out,), jnp.float32),
        ))
    # replicate the module's (quirky) in_size bookkeeping: seq_len // stride + 1
    seq_len = config['seq_len']
    for s in config['conv_stride']:
        seq_len = seq_len // s + 1
    in_size = seq_len * config['n_filters'][-1]
    for size in config['dense_size']:
        key, k1, k2, k3, k4 = jax.random.split(key, 5)
        params['dense'].append(dict(
            w=0.2 * jax.random.normal(k1, (size, in_size), jnp.float32),
            b=0.1 * jax.random.normal(k2, (size,), jnp.float32),
            gamma=1.0 + 0.1 * jax.random.normal(k3, (size,), jnp.float32),
            beta=0.1 * jax.random.normal(k4, (size,), jnp.float32),
            mean=jnp.zeros((size,), jnp.float32),
            var=jnp.ones((size,), jnp.float32),
        ))
        in_size = size
    key, k1, k2 = jax.random.split(key, 3)
    params['out'] = dict(
        w=0.2 * jax.random.normal(k1, (1, in_size), jnp.float32),
        b=0.1 * jax.random.normal(k2, (1,), jnp.float32),
    )
    return params


# ------------------------------ references ----------------------------------

def _ref_gemm_stack(x, layers, use_bf16):
    """Plain-jnp replay of the fused kernel's math (for verification)."""
    h = x.astype(jnp.float32)
    for w, s, b, relu in layers:
        if use_bf16:
            y = jnp.dot(h.astype(jnp.bfloat16), w.astype(jnp.bfloat16),
                        preferred_element_type=jnp.float32)
        else:
            y = jnp.dot(h, w, precision=lax.Precision.HIGHEST)
        y = y * s + b
        h = jnp.maximum(y, 0.0) if relu else y
    return h


def _ref_direct(params, config, x):
    """Faithful f32 NCL reference (im2col conv path), mirrors the PyTorch module."""
    B = x.shape[0]
    h = x[:, None, :]                                  # unsqueeze(1) -> (B, 1, L)
    for i, p in enumerate(params['convs']):
        k = config['kernel_size'][i]
        stride = config['conv_stride'][i]
        pad = k // 2
        hp = jnp.pad(h, ((0, 0), (0, 0), (pad, pad)))
        l_out = (h.shape[2] + 2 * pad - k) // stride + 1
        cols = [hp[:, :, o * stride:o * stride + k] for o in range(l_out)]
        patches = jnp.stack(cols, axis=1).reshape(B * l_out, -1)  # (B*L_out, C_in*k)
        c_out = p['w'].shape[0]
        scale, shift = fold_bn(p['b'], p['gamma'], p['beta'], p['mean'], p['var'])
        y = jnp.dot(patches, p['w'].reshape(c_out, -1).T,
                    precision=lax.Precision.HIGHEST)
        y = jnp.maximum(y * scale + shift, 0.0)
        h = y.reshape(B, l_out, c_out).transpose(0, 2, 1)         # back to NCL
    h = h.reshape(B, -1)                                          # x.view(B, -1)
    for p in params['dense']:
        scale, shift = fold_bn(p['b'], p['gamma'], p['beta'], p['mean'], p['var'])
        h = jnp.maximum(jnp.dot(h, p['w'].T, precision=lax.Precision.HIGHEST)
                        * scale + shift, 0.0)
    return jnp.dot(h, params['out']['w'].T,
                   precision=lax.Precision.HIGHEST) + params['out']['b']


# --------------------------------- main --------------------------------------

if __name__ == "__main__":
    config = {
        'use_cuda': False,
        'seq_len': 16,
        'n_filters': [4, 8],
        'kernel_size': [5, 3],
        'conv_stride': [3, 5],   # chosen so the module's out_seq_len formula matches the real conv output
        'dense_size': [32],
        'dropout': 0.0,
    }
    key = jax.random.PRNGKey(0)
    key, kp, kx, kl = jax.random.split(key, 4)
    params = init_params(config, kp)
    x = jax.random.normal(kx, (2, config['seq_len']), jnp.float32)
    labels = jax.random.normal(kl, (2, 1), jnp.float32)

    @jax.jit
    def fwd(params, x, labels):
        return conv_transformer_forward(params, config, x, labels)

    out, loss = fwd(params, x, labels)
    out = jax.block_until_ready(out)
    loss = jax.block_until_ready(loss)
    assert out.shape == (2, 1) and loss.shape == ()

    # 1) conv->dense unfolding + flatten-order bookkeeping is exact (pure f32 check).
    layers = build_gemm_stack(params, config)
    ref_unfolded_f32 = _ref_gemm_stack(x, layers, use_bf16=False)
    ref_direct_f32 = _ref_direct(params, config, x)
    assert jnp.allclose(ref_unfolded_f32, ref_direct_f32, rtol=1e-4, atol=1e-4), \
        "conv unfolding mismatch vs direct reference"

    # 2) kernel matches the same math computed in plain jnp (bf16 MXU inputs, f32 accum) ...
    ref_bf16 = _ref_gemm_stack(x, layers, use_bf16=True)
    assert jnp.allclose(out, ref_bf16, rtol=1e-2, atol=1e-2), \
        "kernel mismatch vs like-for-like jnp reference"
    # 3) ... and stays close to the full-f32 module semantics.
    assert jnp.allclose(out, ref_direct_f32, rtol=5e-2, atol=5e-2), \
        "kernel drifted from f32 module semantics"

    print("KERNEL_OK")
</pallas_src>

<mosaic_0001>
module attributes {stable_mosaic.version = 11 : i64} {
  func.func @_fused_forward_kernel(%arg0: i32, %arg1: memref<2x16xf32, #tpu.memory_space<vmem>>, %arg2: memref<16x24xbf16, #tpu.memory_space<vmem>>, %arg3: memref<24x16xbf16, #tpu.memory_space<vmem>>, %arg4: memref<16x32xbf16, #tpu.memory_space<vmem>>, %arg5: memref<32x1xbf16, #tpu.memory_space<vmem>>, %arg6: memref<1x24xf32, #tpu.memory_space<vmem>>, %arg7: memref<1x16xf32, #tpu.memory_space<vmem>>, %arg8: memref<1x32xf32, #tpu.memory_space<vmem>>, %arg9: memref<1x1xf32, #tpu.memory_space<vmem>>, %arg10: memref<1x24xf32, #tpu.memory_space<vmem>>, %arg11: memref<1x16xf32, #tpu.memory_space<vmem>>, %arg12: memref<1x32xf32, #tpu.memory_space<vmem>>, %arg13: memref<1x1xf32, #tpu.memory_space<vmem>>, %arg14: memref<2x1xf32, #tpu.memory_space<vmem>>) attributes {dimension_semantics = [#tpu.dimension_semantics<parallel>], iteration_bounds = array<i64: 1>, scalar_prefetch = 0 : i64, scratch_operands = 0 : i64, tpu.core_type = #tpu.core_type<tc>, window_params = [{transform_indices = @transform_0, window_bounds = array<i64: 2, 16>}, {pipeline_mode = #tpu.pipeline_mode<synchronous>, transform_indices = @transform_1, window_bounds = array<i64: 16, 24>}, {pipeline_mode = #tpu.pipeline_mode<synchronous>, transform_indices = @transform_2, window_bounds = array<i64: 24, 16>}, {pipeline_mode = #tpu.pipeline_mode<synchronous>, transform_indices = @transform_3, window_bounds = array<i64: 16, 32>}, {pipeline_mode = #tpu.pipeline_mode<synchronous>, transform_indices = @transform_4, window_bounds = array<i64: 32, 1>}, {pipeline_mode = #tpu.pipeline_mode<synchronous>, transform_indices = @transform_5, window_bounds = array<i64: 1, 24>}, {pipeline_mode = #tpu.pipeline_mode<synchronous>, transform_indices = @transform_6, window_bounds = array<i64: 1, 16>}, {pipeline_mode = #tpu.pipeline_mode<synchronous>, transform_indices = @transform_7, window_bounds = array<i64: 1, 32>}, {pipeline_mode = #tpu.pipeline_mode<synchronous>, transform_indices = @transform_8, window_bounds = array<i64: 1, 1>}, {pipeline_mode = #tpu.pipeline_mode<synchronous>, transform_indices = @transform_9, window_bounds = array<i64: 1, 24>}, {pipeline_mode = #tpu.pipeline_mode<synchronous>, transform_indices = @transform_10, window_bounds = array<i64: 1, 16>}, {pipeline_mode = #tpu.pipeline_mode<synchronous>, transform_indices = @transform_11, window_bounds = array<i64: 1, 32>}, {pipeline_mode = #tpu.pipeline_mode<synchronous>, transform_indices = @transform_12, window_bounds = array<i64: 1, 1>}, {transform_indices = @transform_13, window_bounds = array<i64: 2, 1>}]} {
    %c0 = arith.constant 0 : index
    %c0_0 = arith.constant 0 : index
    %0 = vector.load %arg1[%c0, %c0_0] : memref<2x16xf32, #tpu.memory_space<vmem>>, vector<2x16xf32>
    %1 = arith.truncf %0 : vector<2x16xf32> to vector<2x16xbf16>
    %c0_1 = arith.constant 0 : index
    %c0_2 = arith.constant 0 : index
    %2 = vector.load %arg2[%c0_1, %c0_2] : memref<16x24xbf16, #tpu.memory_space<vmem>>, vector<16x24xbf16>
    %cst = arith.constant dense<0.000000e+00> : vector<2x24xf32>
    %3 = tpu.matmul %1, %2, %cst {dimension_numbers = #tpu.dot_dimension_numbers<[1], [0], [0], [1], [0, 0, 1, 1], [], []>} : vector<2x16xbf16>, vector<16x24xbf16>, vector<2x24xf32> -> vector<2x24xf32>
    %c0_3 = arith.constant 0 : index
    %c0_4 = arith.constant 0 : index
    %4 = vector.load %arg6[%c0_3, %c0_4] : memref<1x24xf32, #tpu.memory_space<vmem>>, vector<1x24xf32>
    %5 = vector.broadcast %4 : vector<1x24xf32> to vector<2x24xf32>
    %6 = arith.mulf %3, %5 : vector<2x24xf32>
    %c0_5 = arith.constant 0 : index
    %c0_6 = arith.constant 0 : index
    %7 = vector.load %arg10[%c0_5, %c0_6] : memref<1x24xf32, #tpu.memory_space<vmem>>, vector<1x24xf32>
    %8 = vector.broadcast %7 : vector<1x24xf32> to vector<2x24xf32>
    %9 = arith.addf %6, %8 : vector<2x24xf32>
    %cst_7 = arith.constant 0.000000e+00 : f32
    %10 = vector.broadcast %cst_7 : f32 to vector<2x24xf32>
    %11 = arith.maximumf %9, %10 : vector<2x24xf32>
    %12 = arith.truncf %11 : vector<2x24xf32> to vector<2x24xbf16>
    %c0_8 = arith.constant 0 : index
    %c0_9 = arith.constant 0 : index
    %13 = vector.load %arg3[%c0_8, %c0_9] : memref<24x16xbf16, #tpu.memory_space<vmem>>, vector<24x16xbf16>
    %cst_10 = arith.constant dense<0.000000e+00> : vector<2x16xf32>
    %14 = tpu.matmul %12, %13, %cst_10 {dimension_numbers = #tpu.dot_dimension_numbers<[1], [0], [0], [1], [0, 0, 1, 1], [], []>} : vector<2x24xbf16>, vector<24x16xbf16>, vector<2x16xf32> -> vector<2x16xf32>
    %c0_11 = arith.constant 0 : index
    %c0_12 = arith.constant 0 : index
    %15 = vector.load %arg7[%c0_11, %c0_12] : memref<1x16xf32, #tpu.memory_space<vmem>>, vector<1x16xf32>
    %16 = vector.broadcast %15 : vector<1x16xf32> to vector<2x16xf32>
    %17 = arith.mulf %14, %16 : vector<2x16xf32>
    %c0_13 = arith.constant 0 : index
    %c0_14 = arith.constant 0 : index
    %18 = vector.load %arg11[%c0_13, %c0_14] : memref<1x16xf32, #tpu.memory_space<vmem>>, vector<1x16xf32>
    %19 = vector.broadcast %18 : vector<1x16xf32> to vector<2x16xf32>
    %20 = arith.addf %17, %19 : vector<2x16xf32>
    %cst_15 = arith.constant 0.000000e+00 : f32
    %21 = vector.broadcast %cst_15 : f32 to vector<2x16xf32>
    %22 = arith.maximumf %20, %21 : vector<2x16xf32>
    %23 = arith.truncf %22 : vector<2x16xf32> to vector<2x16xbf16>
    %c0_16 = arith.constant 0 : index
    %c0_17 = arith.constant 0 : index
    %24 = vector.load %arg4[%c0_16, %c0_17] : memref<16x32xbf16, #tpu.memory_space<vmem>>, vector<16x32xbf16>
    %cst_18 = arith.constant dense<0.000000e+00> : vector<2x32xf32>
    %25 = tpu.matmul %23, %24, %cst_18 {dimension_numbers = #tpu.dot_dimension_numbers<[1], [0], [0], [1], [0, 0, 1, 1], [], []>} : vector<2x16xbf16>, vector<16x32xbf16>, vector<2x32xf32> -> vector<2x32xf32>
    %c0_19 = arith.constant 0 : index
    %c0_20 = arith.constant 0 : index
    %26 = vector.load %arg8[%c0_19, %c0_20] : memref<1x32xf32, #tpu.memory_space<vmem>>, vector<1x32xf32>
    %27 = vector.broadcast %26 : vector<1x32xf32> to vector<2x32xf32>
    %28 = arith.mulf %25, %27 : vector<2x32xf32>
    %c0_21 = arith.constant 0 : index
    %c0_22 = arith.constant 0 : index
    %29 = vector.load %arg12[%c0_21, %c0_22] : memref<1x32xf32, #tpu.memory_space<vmem>>, vector<1x32xf32>
    %30 = vector.broadcast %29 : vector<1x32xf32> to vector<2x32xf32>
    %31 = arith.addf %28, %30 : vector<2x32xf32>
    %cst_23 = arith.constant 0.000000e+00 : f32
    %32 = vector.broadcast %cst_23 : f32 to vector<2x32xf32>
    %33 = arith.maximumf %31, %32 : vector<2x32xf32>
    %34 = arith.truncf %33 : vector<2x32xf32> to vector<2x32xbf16>
    %c0_24 = arith.constant 0 : index
    %c0_25 = arith.constant 0 : index
    %35 = vector.load %arg5[%c0_24, %c0_25] : memref<32x1xbf16, #tpu.memory_space<vmem>>, vector<32x1xbf16>
    %cst_26 = arith.constant dense<0.000000e+00> : vector<2x1xf32>
    %36 = tpu.matmul %34, %35, %cst_26 {dimension_numbers = #tpu.dot_dimension_numbers<[1], [0], [0], [1], [0, 0, 1, 1], [], []>} : vector<2x32xbf16>, vector<32x1xbf16>, vector<2x1xf32> -> vector<2x1xf32>
    %c0_27 = arith.constant 0 : index
    %c0_28 = arith.constant 0 : index
    %37 = vector.load %arg9[%c0_27, %c0_28] : memref<1x1xf32, #tpu.memory_space<vmem>>, vector<1x1xf32>
    %38 = vector.broadcast %37 : vector<1x1xf32> to vector<2x1xf32>
    %39 = arith.mulf %36, %38 : vector<2x1xf32>
    %c0_29 = arith.constant 0 : index
    %c0_30 = arith.constant 0 : index
    %40 = vector.load %arg13[%c0_29, %c0_30] : memref<1x1xf32, #tpu.memory_space<vmem>>, vector<1x1xf32>
    %41 = vector.broadcast %40 : vector<1x1xf32> to vector<2x1xf32>
    %42 = arith.addf %39, %41 : vector<2x1xf32>
    %c0_31 = arith.constant 0 : index
    %c0_32 = arith.constant 0 : index
    %43 = vector.load %arg14[%c0_31, %c0_32] : memref<2x1xf32, #tpu.memory_space<vmem>>, vector<2x1xf32>
    tpu.vector_store %arg14[%c0_31, %c0_32], %42 {strides = array<i32>} : memref<2x1xf32, #tpu.memory_space<vmem>>, vector<2x1xf32>,
    return
  }
  func.func @transform_0(%arg0: i32) -> (i32, i32) {
    %c0_i32 = arith.constant 0 : i32
    %c0_i32_0 = arith.constant 0 : i32
    return %arg0, %c0_i32 : i32, i32
  }
  func.func @transform_1(%arg0: i32) -> (i32, i32) {
    %c0_i32 = arith.constant 0 : i32
    %c0_i32_0 = arith.constant 0 : i32
    %c0_i32_1 = arith.constant 0 : i32
    return %c0_i32, %c0_i32_0 : i32, i32
  }
  func.func @transform_2(%arg0: i32) -> (i32, i32) {
    %c0_i32 = arith.constant 0 : i32
    %c0_i32_0 = arith.constant 0 : i32
    %c0_i32_1 = arith.constant 0 : i32
    return %c0_i32, %c0_i32_0 : i32, i32
  }
  func.func @transform_3(%arg0: i32) -> (i32, i32) {
    %c0_i32 = arith.constant 0 : i32
    %c0_i32_0 = arith.constant 0 : i32
    %c0_i32_1 = arith.constant 0 : i32
    return %c0_i32, %c0_i32_0 : i32, i32
  }
  func.func @transform_4(%arg0: i32) -> (i32, i32) {
    %c0_i32 = arith.constant 0 : i32
    %c0_i32_0 = arith.constant 0 : i32
    %c0_i32_1 = arith.constant 0 : i32
    return %c0_i32, %c0_i32_0 : i32, i32
  }
  func.func @transform_5(%arg0: i32) -> (i32, i32) {
    %c0_i32 = arith.constant 0 : i32
    %c0_i32_0 = arith.constant 0 : i32
    %c0_i32_1 = arith.constant 0 : i32
    return %c0_i32, %c0_i32_0 : i32, i32
  }
  func.func @transform_6(%arg0: i32) -> (i32, i32) {
    %c0_i32 = arith.constant 0 : i32
    %c0_i32_0 = arith.constant 0 : i32
    %c0_i32_1 = arith.constant 0 : i32
    return %c0_i32, %c0_i32_0 : i32, i32
  }
  func.func @transform_7(%arg0: i32) -> (i32, i32) {
    %c0_i32 = arith.constant 0 : i32
    %c0_i32_0 = arith.constant 0 : i32
    %c0_i32_1 = arith.constant 0 : i32
    return %c0_i32, %c0_i32_0 : i32, i32
  }
  func.func @transform_8(%arg0: i32) -> (i32, i32) {
    %c0_i32 = arith.constant 0 : i32
    %c0_i32_0 = arith.constant 0 : i32
    %c0_i32_1 = arith.constant 0 : i32
    return %c0_i32, %c0_i32_0 : i32, i32
  }
  func.func @transform_9(%arg0: i32) -> (i32, i32) {
    %c0_i32 = arith.constant 0 : i32
    %c0_i32_0 = arith.constant 0 : i32
    %c0_i32_1 = arith.constant 0 : i32
    return %c0_i32, %c0_i32_0 : i32, i32
  }
  func.func @transform_10(%arg0: i32) -> (i32, i32) {
    %c0_i32 = arith.constant 0 : i32
    %c0_i32_0 = arith.constant 0 : i32
    %c0_i32_1 = arith.constant 0 : i32
    return %c0_i32, %c0_i32_0 : i32, i32
  }
  func.func @transform_11(%arg0: i32) -> (i32, i32) {
    %c0_i32 = arith.constant 0 : i32
    %c0_i32_0 = arith.constant 0 : i32
    %c0_i32_1 = arith.constant 0 : i32
    return %c0_i32, %c0_i32_0 : i32, i32
  }
  func.func @transform_12(%arg0: i32) -> (i32, i32) {
    %c0_i32 = arith.constant 0 : i32
    %c0_i32_0 = arith.constant 0 : i32
    %c0_i32_1 = arith.constant 0 : i32
    return %c0_i32, %c0_i32_0 : i32, i32
  }
  func.func @transform_13(%arg0: i32) -> (i32, i32) {
    %c0_i32 = arith.constant 0 : i32
    %c0_i32_0 = arith.constant 0 : i32
    return %arg0, %c0_i32 : i32, i32
  }
}

</mosaic_0001>

<bundles_post_ra>
// kernel: tile.35
= control target key start
LH: loop header
LB: loop body
LE: loop exit
PB: predicated region body
PF: predicated region fallthrough
CT: control target
= control target key end

     0   :  { %s22_s0 = inlined_call_operand.vmem [shape: f32[8], index: 0, kind: input, shape index: {}]   ;;  %s23_s1 = inlined_call_operand.vmem [shape: f32[2,8], index: 1, kind: output, shape index: {}]  }
   0x1   :  { %v4_v0 = vld [vmem:[%s22_s0] ss:$0 sm:$0xff] }
   0x2   :  { %5 = vst [vmem:[%s23_s1] sm:$0x3] %v4_v0 }

// kernel: tile.39
= control target key start
LH: loop header
LB: loop body
LE: loop exit
PB: predicated region body
PF: predicated region fallthrough
CT: control target
= control target key end

     0   :  { %vm7_vm0 = vcmask 64512   ;;  %vm13_vm1 = vcmask 130112   ;;  %s39_s0 = inlined_call_operand.vmem [shape: f32[2,8], index: 0, kind: input, shape index: {}]   ;;  %s40_s1 = inlined_call_operand.vmem [shape: f32[1,16], index: 1, kind: output, shape index: {}]  }
   0x1   :  { %v4_v0 = vld [vmem:[%s39_s0] sm:$0x3]  ;;  %s22_s0 = smov 8  }
   0x2   :  { %5 = vst [vmem:[#allocation1] sm:$0x3] %v4_v0 }
   0x9   :  { %v10_v1 = vld [vmem:[#allocation1 + $0x1] sm:$0x1]   ;;  %v6_v2 = vld [vmem:[#allocation1] sm:$0x1]  }
   0xa   :  { %11 = vrot.lane.b32.xlu0 %v10_v1, %s22_s0  ;;  %8 = vst.msk [vmem:[#allocation0] sm:$0x1] %vm7_vm0, %v6_v2  }
  0x7c   :  { %v12_v3 = vpop.permute.xlu0 %11  }
  0x7d   :  { %14 = vst.msk [vmem:[#allocation0] sm:$0x1] %vm13_vm1, %v12_v3  }
  0x84   :  { %v18_v4 = vld [vmem:[#allocation0] sm:$0x1] }
  0x85   :  { %20 = vst [vmem:[%s40_s1] sm:$0x1] %v18_v4 }

// kernel: tile.27
= control target key start
LH: loop header
LB: loop body
LE: loop exit
PB: predicated region body
PF: predicated region fallthrough
CT: control target
= control target key end

     0   :  { %s22_s0 = inlined_call_operand.vmem [shape: f32[4], index: 0, kind: input, shape index: {}]   ;;  %s23_s1 = inlined_call_operand.vmem [shape: f32[6,4], index: 1, kind: output, shape index: {}]  }
   0x1   :  { %v4_v0 = vld [vmem:[%s22_s0] ss:$0 sm:$0xff] }
   0x2   :  { %5 = vst [vmem:[%s23_s1] sm:$0xff] %v4_v0 }

// kernel: tile.38
= control target key start
LH: loop header
LB: loop body
LE: loop exit
PB: predicated region body
PF: predicated region fallthrough
CT: control target
= control target key end

     0   :  { %s51_s10 = smov 20   ;;  %s52_s11 = smov 12   ;;  %vm3_vm0 = vcmask 31744   ;;  %vm9_vm1 = vcmask 195744   ;;  %vm15_vm2 = vcmask 162944   ;;  %vm21_vm3 = vcmask 130144   ;;  %s87_s0 = inlined_call_operand.vmem [shape: f32[6,4], index: 0, kind: input, shape index: {}]   ;;  %s88_s1 = inlined_call_operand.vmem [shape: f32[1,24], index: 1, kind: output, shape index: {}]  }
   0x1   :  { %v41_v0 = vld [vmem:[%s87_s0 + $0x5] sm:$0x1]   ;;  %v43_v1 = vld [vmem:[%s87_s0 + $0x3] sm:$0x1]   ;;  %v42_v2 = vld [vmem:[%s87_s0 + $0x4] sm:$0x1]  }
   0x2   :  { %7 = vrot.lane.b32.xlu0 %v41_v0, %s51_s10  ;;  %19 = vrot.lane.b32.xlu1 %v43_v1, %s52_s11  ;;  %v44_v3 = vld [vmem:[%s87_s0 + $0x2] sm:$0x1]   ;;  %v2_v4 = vld [vmem:[%s87_s0] sm:$0x1]   ;;  %s53_s18 = smov 16   ;;  %s54_s19 = smov 8  }
   0x3   :  { %4 = vst.msk [vmem:[#allocation0] sm:$0x1] %vm3_vm0, %v2_v4   ;;  %v45_v5 = vld [vmem:[%s87_s0 + $0x1] sm:$0x1]   ;;  %s55_s0 = smov 4   ;;  %vm27_vm4 = vcmask 97344  }
   0x4   :  { %vm33_vm5 = vcmask 64544  }
   0x6   :  { %13 = vrot.lane.b32.xlu0 %v42_v2, %s53_s18  ;;  %25 = vrot.lane.b32.xlu1 %v44_v3, %s54_s19 }
   0xa   :  { %31 = vrot.lane.b32.xlu0 %v45_v5, %s55_s0 }
  0x74   :  { %v8_v6 = vpop.permute.xlu0 %7   ;;  %v20_v7 = vpop.permute.xlu1 %19  }
  0x75   :  { %10 = vst.msk [vmem:[#allocation0] sm:$0x1] %vm9_vm1, %v8_v6  }
  0x78   :  { %v14_v8 = vpop.permute.xlu0 %13   ;;  %v26_v9 = vpop.permute.xlu1 %25  }
  0x79   :  { %16 = vst.msk [vmem:[#allocation0] sm:$0x1] %vm15_vm2, %v14_v8  }
  0x7a   :  { %22 = vst.msk [vmem:[#allocation0] sm:$0x1] %vm21_vm3, %v20_v7  }
  0x7b   :  { %28 = vst.msk [vmem:[#allocation0] sm:$0x1] %vm27_vm4, %v26_v9  }
  0x7c   :  { %v32_v10 = vpop.permute.xlu0 %31  }
  0x7d   :  { %34 = vst.msk [vmem:[#allocation0] sm:$0x1] %vm33_vm5, %v32_v10  }
  0x84   :  { %v38_v11 = vld [vmem:[#allocation0] sm:$0x1] }
  0x85   :  { %40 = vst [vmem:[%s88_s1] sm:$0x1] %v38_v11 }

// kernel: fwd.1
= control target key start
LH: loop header
LB: loop body
LE: loop exit
PB: predicated region body
PF: predicated region fallthrough
CT: control target
= control target key end

     0   :  { %v414_v0 = vmov 0.0   ;;  %vm415_vm0 = vmmov 0   ;;  %vm59_vm1 = vcmask 130048   ;;  %vm137_vm2 = vcmask 1043456   ;;  %s540_s1 = inlined_call_operand.vmem [shape: bf16[16,24], index: 1, kind: input, shape index: {}]   ;;  %s541_s0 = inlined_call_operand.vmem [shape: f32[2,16], index: 0, kind: input, shape index: {}]   ;;  %s542_s2 = inlined_call_operand.vmem [shape: bf16[24,16], index: 2, kind: input, shape index: {}]   ;;  %s543_s5 = inlined_call_operand.vmem [shape: f32[1,24], index: 5, kind: input, shape index: {}]   ;;  %s544_s9 = inlined_call_operand.vmem [shape: f32[1,24], index: 9, kind: input, shape index: {}]   ;;  %s545_s3 = inlined_call_operand.vmem [shape: bf16[16,32], index: 3, kind: input, shape index: {}]   ;;  %s546_s6 = inlined_call_operand.vmem [shape: f32[1,16], index: 6, kind: input, shape index: {}]   ;;  %s547_s10 = inlined_call_operand.vmem [shape: f32[1,16], index: 10, kind: input, shape index: {}]   ;;  %s548_s4 = inlined_call_operand.vmem [shape: bf16[32,1], index: 4, kind: input, shape index: {}]   ;;  %s549_s8 = inlined_call_operand.<no memory space> [shape: f32[1,1], index: 8, kind: input, shape index: {}]   ;;  %s550_s12 = inlined_call_operand.<no memory space> [shape: f32[1,1], index: 12, kind: input, shape index: {}]   ;;  %s551_s7 = inlined_call_operand.vmem [shape: f32[1,32], index: 7, kind: input, shape index: {}]   ;;  %s552_s11 = inlined_call_operand.vmem [shape: f32[1,32], index: 11, kind: input, shape index: {}]   ;;  %s553_s13 = inlined_call_operand.vmem [shape: f32[2,1], index: 13, kind: output, shape index: {}]  }
   0x1   :  { %378 = vmatprep.subr.bf16.mxu0 %v414_v0  ;;  %v408_v1 = vld [vmem:[%s540_s1] sm:$0xff]   ;;  %380 = vmatprep.mubr.msk.bf16.mxu0 %vm415_vm0, %v414_v0  ;;  %v410_v5 = vld [vmem:[%s542_s2 + $0x8] ss:$0 sps:$4 sm:$0xff]   ;;  %vm133_vm3 = vcmask 195584   ;;  %v18_v30 = vstv %s549_s8  ;;  %v20_v31 = vstv %s550_s12  ;;  %vm284_vm4 = vcmask 261120  }
   0x2   :  { %v49_v2 = vld [vmem:[%s541_s0] sm:$0x3]  ;;  %384 = vmatprep.subr.bf16.mxu1 %v414_v0  ;;  %388 = vmatprep.mubr.msk.bf16.mxu1 %vm415_vm0, %v414_v0  ;;  %v139_v6 = vsel %vm137_vm2, %v410_v5, 0  ;;  %v413_v29 = vld [vmem:[%s548_s4 + $0x8] sm:$0xff]   ;;  %19 = vst [vmem:[#allocation2] sm:$0x1] %v18_v30 }
   0x3   :  { %379 = vmatpush3.bf16.msra.mxu0 %v408_v1  ;;  %v50_v3 = vpack.c.bf16 %v49_v2, %v49_v2  ;;  %v409_v4 = vld [vmem:[%s542_s2] sm:$0xff]   ;;  %21 = vst [vmem:[#allocation3] sm:$0x1] %v20_v31  ;;  %vm344_vm5 = vcmask 1024  }
   0x4   :  { %392 = vmatprep.subr.bf16.mxu0 %v414_v0  ;;  %385 = vmatpush3.bf16.msra.mxu1 %v409_v4  ;;  %v352_v7 = vld [vmem:[%s543_s5] ss:$0 sm:$0xff] }
   0x5   :  { %386 = vmatprep.subr.bf16.mxu1 %v414_v0  ;;  %v353_v9 = vld [vmem:[%s544_s9] ss:$0 sm:$0xff] }
   0x6   :  { %381 = vmatmul.mubr.msk.bf16.vlgmr.msra.gmra.mrb[0].mxu0 %vm59_vm1, %v50_v3  ;;  %v411_v17 = vld [vmem:[%s545_s3] sm:$0xff]  }
   0x7   :  { %394 = vmatprep.mubr.msk.bf16.mxu0 %vm415_vm0, %v414_v0  ;;  %393 = vmatpush3.bf16.msra.mxu0 %v411_v17  ;;  %v357_v18 = vld [vmem:[%s546_s6] ss:$0 sm:$0xff] }
   0x8   :  { %387 = vmatpush3.bf16.msra.mxu1 %v139_v6  ;;  %v358_v20 = vld [vmem:[%s547_s10] ss:$0 sm:$0xff] }
   0x9   :  { %398 = vmatprep.subr.bf16.mxu1 %v414_v0  ;;  %v412_v28 = vld [vmem:[%s548_s4] sm:$0xff]  }
   0xa   :  { %v361_v32 = vld [vmem:[%s551_s7] ss:$0 sm:$0xff]  ;;  %v367_v44 = vld [vmem:[#allocation3] ss:$0 sm:$0xff] }
   0xb   :  { %v362_v34 = vld [vmem:[%s552_s11] ss:$0 sm:$0xff] }
   0xc   :  { %v366_v42 = vld [vmem:[#allocation2] ss:$0 sm:$0xff] }
  0xd9   :  { %v97_v8 = vpop.f32.mrb[0].mxu0 }
  0xda   :  { %v110_v10 = vmul.f32 %v352_v7, %v97_v8  ;;  %v382_v11 = vpop.f32.mrb[1].mxu0 }
  0xdb   :  { %v100_v12 = vpop.f32.mrb[2].mxu0 }
  0xdc   :  { %v118_v13 = vadd.f32 %v353_v9, %v110_v10  ;;  %v383_v14 = vpop.f32.mrb[3].mxu0 }
  0xde   :  { %v119_v15 = vmax.f32 %v118_v13, 0.0 }
  0xe0   :  { %v120_v16 = vpack.c.bf16 %v119_v15, %v119_v15 }
  0xe2   :  { %389 = vmatmul.mubr.msk.bf16.vlgmr.msra.gmra.mrb[0].mxu1 %vm133_vm3, %v120_v16 }
  0xe3   :  { %402 = vmatprep.mubr.msk.bf16.mxu1 %vm415_vm0, %v414_v0  ;;  %399 = vmatpush3.bf16.msra.mxu1 %v412_v28 }
  0xe4   :  { %400 = vmatprep.subr.bf16.mxu1 %v414_v0 }
  0xe7   :  { %401 = vmatpush3.bf16.msra.mxu1 %v413_v29 }
 0x1b5   :  { %v175_v19 = vpop.f32.mrb[0].mxu1 }
 0x1b6   :  { %v188_v21 = vmul.f32 %v357_v18, %v175_v19  ;;  %v390_v22 = vpop.f32.mrb[1].mxu1 }
 0x1b7   :  { %v178_v23 = vpop.f32.mrb[2].mxu1 }
 0x1b8   :  { %v196_v24 = vadd.f32 %v358_v20, %v188_v21  ;;  %v391_v25 = vpop.f32.mrb[3].mxu1 }
 0x1ba   :  { %v197_v26 = vmax.f32 %v196_v24, 0.0 }
 0x1bc   :  { %v198_v27 = vpack.c.bf16 %v197_v26, %v197_v26 }
 0x1be   :  { %395 = vmatmul.mubr.msk.bf16.vlgmr.msra.gmra.mrb[4].mxu0 %vm59_vm1, %v198_v27 }
 0x291   :  { %v244_v33 = vpop.f32.mrb[4].mxu0 }
 0x292   :  { %v257_v35 = vmul.f32 %v361_v32, %v244_v33  ;;  %v396_v36 = vpop.f32.mrb[5].mxu0 }
 0x293   :  { %v247_v37 = vpop.f32.mrb[6].mxu0 }
 0x294   :  { %v265_v38 = vadd.f32 %v362_v34, %v257_v35  ;;  %v397_v39 = vpop.f32.mrb[7].mxu0 }
 0x296   :  { %v266_v40 = vmax.f32 %v265_v38, 0.0 }
 0x298   :  { %v267_v41 = vpack.c.bf16 %v266_v40, %v266_v40 }
 0x29a   :  { %403 = vmatmul.mubr.msk.bf16.vlgmr.msra.gmra.mrb[4].mxu1 %vm284_vm4, %v267_v41 }
 0x36d   :  { %v322_v43 = vpop.f32.mrb[4].mxu1 }
 0x36e   :  { %v335_v45 = vmul.f32 %v366_v42, %v322_v43  ;;  %v404_v46 = vpop.f32.mrb[5].mxu1 }
 0x36f   :  { %v325_v47 = vpop.f32.mrb[6].mxu1 }
 0x370   :  { %v343_v48 = vadd.f32 %v367_v44, %v335_v45  ;;  %v405_v49 = vpop.f32.mrb[7].mxu1 }
 0x372   :  { %345 = vst.msk [vmem:[%s553_s13] sm:$0x3] %vm344_vm5, %v343_v48 }

</bundles_post_ra>
